<compile_context>
chip_gen: v6e
topology: v6e:2x2x1
jax: 0.10.0
libtpu: 0.0.40
codegen_flags: <defaults>
</compile_context>

<pallas_src>
import functools

import jax
import jax.numpy as jnp
from jax.experimental import pallas as pl
from jax.experimental.pallas import tpu as pltpu

HIDDEN_LAYER = 256
N_ACTIONS = 9        # len(AVAILABLE_ACTIONS)
N_PAD = 128          # lane-dense padded output width
IN_FEATURES = 36


def _round_up(n, m):
    return ((n + m - 1) // m) * m


def dqn_kernel(x_ref, w1_ref, b1_ref, w2_ref, b2_ref, w3_ref, b3_ref, o_ref):
    # x arrives as f32 and is cast to bf16 in-kernel (VPU work hidden under the
    # MXU).  Matmuls accumulate in f32 on the MXU; bias add + ReLU run in f32;
    # activations are recast to bf16 only to feed the next MXU pass.  The
    # final (TM, 128) tile is stored as bf16 to halve output HBM traffic.
    x = x_ref[...].astype(jnp.bfloat16)                              # (TM, 36)
    h1 = jnp.dot(x, w1_ref[...], preferred_element_type=jnp.float32) + b1_ref[...]
    h1 = jnp.maximum(h1, 0.0).astype(jnp.bfloat16)                   # (TM, 256)
    h2 = jnp.dot(h1, w2_ref[...], preferred_element_type=jnp.float32) + b2_ref[...]
    h2 = jnp.maximum(h2, 0.0).astype(jnp.bfloat16)                   # (TM, 256)
    y = jnp.dot(h2, w3_ref[...], preferred_element_type=jnp.float32) + b3_ref[...]
    o_ref[...] = y.astype(jnp.bfloat16)                              # (TM, 128) bf16


@functools.partial(jax.jit, static_argnames=("tile_m",))
def dqn_forward(x, packed_params, tile_m=1024):
    """x: (B, 36) float32 -> (B, 9) float32."""
    w1, b1, w2, b2, w3p, b3p = packed_params
    B = x.shape[0]

    # Batch tile: multiple of 8 (sublane).  cdiv(B, 2) so that whenever B > 8
    # the grid has >= 2 steps and v7x can shard them across both TensorCores;
    # capped at tile_m (multiple of 128) so v5e/v6e use few, large tiles.
    TM = max(8, min(tile_m, _round_up(pl.cdiv(B, 2), 8)))
    grid = (pl.cdiv(B, TM),)   # partial last block clipped by Pallas (no jnp.pad)

    out_padded = pl.pallas_call(
        dqn_kernel,
        out_shape=jax.ShapeDtypeStruct((B, N_PAD), jnp.bfloat16),
        grid=grid,
        in_specs=[
            # x: tiled over the batch grid axis (f32; cast happens in-kernel).
            pl.BlockSpec((TM, IN_FEATURES), lambda i: (i, 0)),
            # Weights/biases: constant index_map -> VMEM-resident across steps.
            pl.BlockSpec((IN_FEATURES, HIDDEN_LAYER), lambda i: (0, 0)),
            pl.BlockSpec((1, HIDDEN_LAYER), lambda i: (0, 0)),
            pl.BlockSpec((HIDDEN_LAYER, HIDDEN_LAYER), lambda i: (0, 0)),
            pl.BlockSpec((1, HIDDEN_LAYER), lambda i: (0, 0)),
            pl.BlockSpec((HIDDEN_LAYER, N_PAD), lambda i: (0, 0)),
            pl.BlockSpec((1, N_PAD), lambda i: (0, 0)),
        ],
        out_specs=pl.BlockSpec((TM, N_PAD), lambda i: (i, 0)),
        compiler_params=pltpu.CompilerParams(
            dimension_semantics=("parallel",),          # v7x: shard over both TCs
            vmem_limit_bytes=32 * 1024 * 1024,           # portable to v7x's 64 MiB VMEM
        ),
    )(x, w1, b1, w2, b2, w3p, b3p)

    # Under jit this slice + cast fuses with the consumer instead of being a
    # standalone XLA pass over the padded buffer.
    return out_padded[:, :N_ACTIONS].astype(jnp.float32)


def init_params(key):
    """f32 master params mimicking PyTorch's default nn.Linear init:
    U(-1/sqrt(fan_in), 1/sqrt(fan_in)). Weights stored as (in, out)."""
    def linear(key, fan_in, fan_out):
        kw, kb = jax.random.split(key)
        bound = 1.0 / jnp.sqrt(fan_in)
        w = jax.random.uniform(kw, (fan_in, fan_out), jnp.float32, -bound, bound)
        b = jax.random.uniform(kb, (1, fan_out), jnp.float32, -bound, bound)
        return w, b

    k1, k2, k3 = jax.random.split(key, 3)
    w1, b1 = linear(k1, IN_FEATURES, HIDDEN_LAYER)
    w2, b2 = linear(k2, HIDDEN_LAYER, HIDDEN_LAYER)
    w3, b3 = linear(k3, HIDDEN_LAYER, N_ACTIONS)
    return w1, b1, w2, b2, w3, b3


def pack_params(params):
    """Convert f32 master params into kernel params: bf16 weights, f32 biases,
    layer-3 weight/bias zero-padded to 128 output lanes."""
    w1, b1, w2, b2, w3, b3 = params
    w3p = jnp.zeros((HIDDEN_LAYER, N_PAD), jnp.float32).at[:, :N_ACTIONS].set(w3)
    b3p = jnp.zeros((1, N_PAD), jnp.float32).at[:, :N_ACTIONS].set(b3)
    return (w1.astype(jnp.bfloat16), b1,
            w2.astype(jnp.bfloat16), b2,
            w3p.astype(jnp.bfloat16), b3p)


def dqn_reference_f32(x, params):
    w1, b1, w2, b2, w3, b3 = params
    h1 = jnp.maximum(x @ w1 + b1, 0.0)
    h2 = jnp.maximum(h1 @ w2 + b2, 0.0)
    return h2 @ w3 + b3


def dqn_reference_bf16(x, params):
    """Reference mimicking the kernel numerics: bf16 inputs/activations,
    f32 accumulation, bf16 output writeback."""
    w1, b1, w2, b2, w3, b3 = params
    bf = jnp.bfloat16
    h1 = jnp.dot(x.astype(bf), w1.astype(bf), preferred_element_type=jnp.float32) + b1
    h1 = jnp.maximum(h1, 0.0).astype(bf)
    h2 = jnp.dot(h1, w2.astype(bf), preferred_element_type=jnp.float32) + b2
    h2 = jnp.maximum(h2, 0.0).astype(bf)
    y = jnp.dot(h2, w3.astype(bf), preferred_element_type=jnp.float32) + b3
    return y.astype(bf).astype(jnp.float32)


if __name__ == "__main__":
    key = jax.random.PRNGKey(0)
    kx1, kx2, kp = jax.random.split(key, 3)

    params = init_params(kp)
    packed = pack_params(params)

    # Case 1: tiny batch (single grid step, TM = 8).
    B1 = 8
    x1 = jax.random.normal(kx1, (B1, IN_FEATURES), jnp.float32)
    out1 = jax.block_until_ready(dqn_forward(x1, packed))
    assert out1.shape == (B1, N_ACTIONS), out1.shape
    ref1_bf = dqn_reference_bf16(x1, params)
    ref1_f32 = dqn_reference_f32(x1, params)
    assert jnp.allclose(out1, ref1_bf, atol=5e-3, rtol=5e-3), "mismatch vs bf16 reference (B=8)"
    assert jnp.allclose(out1, ref1_f32, atol=5e-2, rtol=5e-2), "mismatch vs f32 reference (B=8)"

    # Case 2: batch that exercises >=2 grid steps + a clipped partial last block
    # (B=40 -> TM=24, grid=(2,), second block covers rows 24..39 of 24).
    B2 = 40
    x2 = jax.random.normal(kx2, (B2, IN_FEATURES), jnp.float32)
    out2 = jax.block_until_ready(dqn_forward(x2, packed))
    assert out2.shape == (B2, N_ACTIONS), out2.shape
    ref2_bf = dqn_reference_bf16(x2, params)
    ref2_f32 = dqn_reference_f32(x2, params)
    assert jnp.allclose(out2, ref2_bf, atol=5e-3, rtol=5e-3), "mismatch vs bf16 reference (B=40)"
    assert jnp.allclose(out2, ref2_f32, atol=5e-2, rtol=5e-2), "mismatch vs f32 reference (B=40)"

    print("KERNEL_OK")
</pallas_src>

<mosaic_0001>
module attributes {stable_mosaic.version = 11 : i64} {
  func.func @dqn_kernel(%arg0: i32, %arg1: memref<8x36xf32, #tpu.memory_space<vmem>>, %arg2: memref<36x256xbf16, #tpu.memory_space<vmem>>, %arg3: memref<1x256xf32, #tpu.memory_space<vmem>>, %arg4: memref<256x256xbf16, #tpu.memory_space<vmem>>, %arg5: memref<1x256xf32, #tpu.memory_space<vmem>>, %arg6: memref<256x128xbf16, #tpu.memory_space<vmem>>, %arg7: memref<1x128xf32, #tpu.memory_space<vmem>>, %arg8: memref<8x128xbf16, #tpu.memory_space<vmem>>) attributes {dimension_semantics = [#tpu.dimension_semantics<parallel>], iteration_bounds = array<i64: 1>, scalar_prefetch = 0 : i64, scratch_operands = 0 : i64, tpu.core_type = #tpu.core_type<tc>, window_params = [{transform_indices = @transform_0, window_bounds = array<i64: 8, 36>}, {pipeline_mode = #tpu.pipeline_mode<synchronous>, transform_indices = @transform_1, window_bounds = array<i64: 36, 256>}, {pipeline_mode = #tpu.pipeline_mode<synchronous>, transform_indices = @transform_2, window_bounds = array<i64: 1, 256>}, {pipeline_mode = #tpu.pipeline_mode<synchronous>, transform_indices = @transform_3, window_bounds = array<i64: 256, 256>}, {pipeline_mode = #tpu.pipeline_mode<synchronous>, transform_indices = @transform_4, window_bounds = array<i64: 1, 256>}, {pipeline_mode = #tpu.pipeline_mode<synchronous>, transform_indices = @transform_5, window_bounds = array<i64: 256, 128>}, {pipeline_mode = #tpu.pipeline_mode<synchronous>, transform_indices = @transform_6, window_bounds = array<i64: 1, 128>}, {transform_indices = @transform_7, window_bounds = array<i64: 8, 128>}]} {
    %c0 = arith.constant 0 : index
    %c0_0 = arith.constant 0 : index
    %0 = vector.load %arg1[%c0, %c0_0] : memref<8x36xf32, #tpu.memory_space<vmem>>, vector<8x36xf32>
    %1 = arith.truncf %0 : vector<8x36xf32> to vector<8x36xbf16>
    %c0_1 = arith.constant 0 : index
    %c0_2 = arith.constant 0 : index
    %2 = vector.load %arg2[%c0_1, %c0_2] : memref<36x256xbf16, #tpu.memory_space<vmem>>, vector<36x256xbf16>
    %cst = arith.constant dense<0.000000e+00> : vector<8x256xf32>
    %3 = tpu.matmul %1, %2, %cst {dimension_numbers = #tpu.dot_dimension_numbers<[1], [0], [0], [1], [0, 0, 1, 1], [], []>} : vector<8x36xbf16>, vector<36x256xbf16>, vector<8x256xf32> -> vector<8x256xf32>
    %c0_3 = arith.constant 0 : index
    %c0_4 = arith.constant 0 : index
    %4 = vector.load %arg3[%c0_3, %c0_4] : memref<1x256xf32, #tpu.memory_space<vmem>>, vector<1x256xf32>
    %5 = vector.broadcast %4 : vector<1x256xf32> to vector<8x256xf32>
    %6 = arith.addf %3, %5 : vector<8x256xf32>
    %cst_5 = arith.constant 0.000000e+00 : f32
    %7 = vector.broadcast %cst_5 : f32 to vector<8x256xf32>
    %8 = arith.maximumf %6, %7 : vector<8x256xf32>
    %9 = arith.truncf %8 : vector<8x256xf32> to vector<8x256xbf16>
    %c0_6 = arith.constant 0 : index
    %c0_7 = arith.constant 0 : index
    %10 = vector.load %arg4[%c0_6, %c0_7] : memref<256x256xbf16, #tpu.memory_space<vmem>>, vector<256x256xbf16>
    %cst_8 = arith.constant dense<0.000000e+00> : vector<8x256xf32>
    %11 = tpu.matmul %9, %10, %cst_8 {dimension_numbers = #tpu.dot_dimension_numbers<[1], [0], [0], [1], [0, 0, 1, 1], [], []>} : vector<8x256xbf16>, vector<256x256xbf16>, vector<8x256xf32> -> vector<8x256xf32>
    %c0_9 = arith.constant 0 : index
    %c0_10 = arith.constant 0 : index
    %12 = vector.load %arg5[%c0_9, %c0_10] : memref<1x256xf32, #tpu.memory_space<vmem>>, vector<1x256xf32>
    %13 = vector.broadcast %12 : vector<1x256xf32> to vector<8x256xf32>
    %14 = arith.addf %11, %13 : vector<8x256xf32>
    %cst_11 = arith.constant 0.000000e+00 : f32
    %15 = vector.broadcast %cst_11 : f32 to vector<8x256xf32>
    %16 = arith.maximumf %14, %15 : vector<8x256xf32>
    %17 = arith.truncf %16 : vector<8x256xf32> to vector<8x256xbf16>
    %c0_12 = arith.constant 0 : index
    %c0_13 = arith.constant 0 : index
    %18 = vector.load %arg6[%c0_12, %c0_13] : memref<256x128xbf16, #tpu.memory_space<vmem>>, vector<256x128xbf16>
    %cst_14 = arith.constant dense<0.000000e+00> : vector<8x128xf32>
    %19 = tpu.matmul %17, %18, %cst_14 {dimension_numbers = #tpu.dot_dimension_numbers<[1], [0], [0], [1], [0, 0, 1, 1], [], []>} : vector<8x256xbf16>, vector<256x128xbf16>, vector<8x128xf32> -> vector<8x128xf32>
    %c0_15 = arith.constant 0 : index
    %c0_16 = arith.constant 0 : index
    %20 = vector.load %arg7[%c0_15, %c0_16] : memref<1x128xf32, #tpu.memory_space<vmem>>, vector<1x128xf32>
    %21 = vector.broadcast %20 : vector<1x128xf32> to vector<8x128xf32>
    %22 = arith.addf %19, %21 : vector<8x128xf32>
    %23 = arith.truncf %22 : vector<8x128xf32> to vector<8x128xbf16>
    %c0_17 = arith.constant 0 : index
    %c0_18 = arith.constant 0 : index
    %24 = vector.load %arg8[%c0_17, %c0_18] : memref<8x128xbf16, #tpu.memory_space<vmem>>, vector<8x128xbf16>
    tpu.vector_store %arg8[%c0_17, %c0_18], %23 {strides = array<i32>} : memref<8x128xbf16, #tpu.memory_space<vmem>>, vector<8x128xbf16>,
    return
  }
  func.func @transform_0(%arg0: i32) -> (i32, i32) {
    %c0_i32 = arith.constant 0 : i32
    %c0_i32_0 = arith.constant 0 : i32
    return %arg0, %c0_i32 : i32, i32
  }
  func.func @transform_1(%arg0: i32) -> (i32, i32) {
    %c0_i32 = arith.constant 0 : i32
    %c0_i32_0 = arith.constant 0 : i32
    %c0_i32_1 = arith.constant 0 : i32
    return %c0_i32, %c0_i32_0 : i32, i32
  }
  func.func @transform_2(%arg0: i32) -> (i32, i32) {
    %c0_i32 = arith.constant 0 : i32
    %c0_i32_0 = arith.constant 0 : i32
    %c0_i32_1 = arith.constant 0 : i32
    return %c0_i32, %c0_i32_0 : i32, i32
  }
  func.func @transform_3(%arg0: i32) -> (i32, i32) {
    %c0_i32 = arith.constant 0 : i32
    %c0_i32_0 = arith.constant 0 : i32
    %c0_i32_1 = arith.constant 0 : i32
    return %c0_i32, %c0_i32_0 : i32, i32
  }
  func.func @transform_4(%arg0: i32) -> (i32, i32) {
    %c0_i32 = arith.constant 0 : i32
    %c0_i32_0 = arith.constant 0 : i32
    %c0_i32_1 = arith.constant 0 : i32
    return %c0_i32, %c0_i32_0 : i32, i32
  }
  func.func @transform_5(%arg0: i32) -> (i32, i32) {
    %c0_i32 = arith.constant 0 : i32
    %c0_i32_0 = arith.constant 0 : i32
    %c0_i32_1 = arith.constant 0 : i32
    return %c0_i32, %c0_i32_0 : i32, i32
  }
  func.func @transform_6(%arg0: i32) -> (i32, i32) {
    %c0_i32 = arith.constant 0 : i32
    %c0_i32_0 = arith.constant 0 : i32
    %c0_i32_1 = arith.constant 0 : i32
    return %c0_i32, %c0_i32_0 : i32, i32
  }
  func.func @transform_7(%arg0: i32) -> (i32, i32) {
    %c0_i32 = arith.constant 0 : i32
    %c0_i32_0 = arith.constant 0 : i32
    return %arg0, %c0_i32 : i32, i32
  }
}

</mosaic_0001>

<bundles_post_ra>
// kernel: dqn_forward.1
= control target key start
LH: loop header
LB: loop body
LE: loop exit
PB: predicated region body
PF: predicated region fallthrough
CT: control target
= control target key end

     0   :  { %12 = vsyncpa [#allocation3], 0  ;;  %s932_s0 = inlined_call_operand.hbm [shape: f32[8,36], index: 0, kind: input, shape index: {}]   ;;  %s933_s1 = inlined_call_operand.hbm [shape: bf16[36,256], index: 1, kind: input, shape index: {}]   ;;  %s934_s2 = inlined_call_operand.vmem [shape: f32[1,256], index: 2, kind: input, shape index: {}]   ;;  %s935_s3 = inlined_call_operand.hbm [shape: bf16[256,256], index: 3, kind: input, shape index: {}]   ;;  %s936_s4 = inlined_call_operand.vmem [shape: f32[1,256], index: 4, kind: input, shape index: {}]   ;;  %s937_s5 = inlined_call_operand.hbm [shape: bf16[256,128], index: 5, kind: input, shape index: {}]   ;;  %s938_s6 = inlined_call_operand.vmem [shape: f32[1,128], index: 6, kind: input, shape index: {}]   ;;  %s939_s7 = inlined_call_operand.vmem [shape: bf16[8,128], index: 7, kind: output, shape index: {}]  }
   0x1   :  { %13 = vsyncpa [#allocation5], 0 }
   0x2   :  { %14 = vsyncpa [#allocation8], 0  ;;  %s859_s24 = smov [#allocation4]  }
   0x3   :  { %s30_s25 = sshll.u32 %s859_s24, 4  ;;  %s31_s25 = int_to_ptr.vmem [resolvable:$true] %s30_s25 }
   0x4   :  { %s781_s26 = scalar_lea.vmem %s31_s25, 640  ;;  %p786_p1 = scmp.lt.s32.totalorder %s31_s25, %s31_s25 }
   0x5   :  { %p782_p0 = scmp.ne.s32.totalorder %s31_s25, %s781_s26  ;;  %p787_p2 = scmp.lt.s32.totalorder %s781_s26, %s781_s26 }
   0x7   :  { %p788_p3 = por %p787_p2, %p786_p1 }
   0x9   :  { %p789_p4 = pnand %p788_p3, %p782_p0 }
   0xb   :  { %792 = shalt.err (!%p789_p4)
}
   0xc   :  { %s860_s27 = smov 128   ;;  %s861_s28 = smov 8  }
   0xd   :  { %36 = dma.hbm_to_vmem [thread:$0]  %s933_s1, 640, %s31_s25, [#allocation5], %s860_s27, %s860_s27, %s861_s28  }
   0xe   :  { %s862_s8 = smov [#allocation2]   ;;  %s863_s10 = smov [#allocation6]  }
   0xf   :  { %s21_s9 = sshll.u32 %s862_s8, 4  ;;  %s44_s11 = sshll.u32 %s863_s10, 4  ;;  %s22_s9 = int_to_ptr.vmem [resolvable:$true] %s21_s9  ;;  %s45_s11 = int_to_ptr.vmem [resolvable:$true] %s44_s11 }
  0x10   :  { %s801_s12 = scalar_lea.vmem %s22_s9, 128  ;;  %p806_p6 = scmp.lt.s32.totalorder %s22_s9, %s22_s9 }
  0x11   :  { %p802_p5 = scmp.ne.s32.totalorder %s22_s9, %s801_s12  ;;  %p807_p7 = scmp.lt.s32.totalorder %s801_s12, %s801_s12 }
  0x13   :  { %p808_p8 = por %p807_p7, %p806_p6 }
  0x15   :  { %p809_p9 = pnand %p808_p8, %p802_p5 }
  0x17   :  { %812 = shalt.err (!%p809_p9)
}
  0x18   :  { %24 = dma.hbm_to_vmem [thread:$0]  %s932_s0, 128, %s22_s9, [#allocation3]  }
  0x19   :  { %s821_s15 = scalar_lea.vmem %s45_s11, 4096  ;;  %p826_p11 = scmp.lt.s32.totalorder %s45_s11, %s45_s11 }
  0x1a   :  { %p822_p10 = scmp.ne.s32.totalorder %s45_s11, %s821_s15  ;;  %p827_p12 = scmp.lt.s32.totalorder %s821_s15, %s821_s15 }
  0x1c   :  { %p828_p13 = por %p827_p12, %p826_p11 }
  0x1e   :  { %p829_p0 = pnand %p828_p13, %p822_p10 }
  0x20   :  { %832 = shalt.err (!%p829_p0)
}
  0x21   :  { %50 = dma.hbm_to_vmem [thread:$0]  %s935_s3, 4096, %s45_s11, [#allocation5], %s860_s27, %s860_s27, %s861_s28  }
  0x22   :  { %s864_s17 = smov [#allocation7]  }
  0x23   :  { %s58_s18 = sshll.u32 %s864_s17, 4  ;;  %s59_s18 = int_to_ptr.vmem [resolvable:$true] %s58_s18 }
  0x24   :  { %s841_s19 = scalar_lea.vmem %s59_s18, 2048  ;;  %p846_p2 = scmp.lt.s32.totalorder %s59_s18, %s59_s18 }
  0x25   :  { %p842_p1 = scmp.ne.s32.totalorder %s59_s18, %s841_s19  ;;  %p847_p3 = scmp.lt.s32.totalorder %s841_s19, %s841_s19 }
  0x27   :  { %p848_p4 = por %p847_p3, %p846_p2 }
  0x29   :  { %p849_p5 = pnand %p848_p4, %p842_p1 }
  0x2b   :  { %852 = shalt.err (!%p849_p5)
}
  0x2c   :  { %s865_s0 = smov 64   ;;  %s866_s20 = smov 4  }
  0x2d   :  { %64 = dma.hbm_to_vmem [thread:$0]  %s937_s5, 2048, %s59_s18, [#allocation8], %s865_s0, %s865_s0, %s866_s20  }
  0x2e   :  { %853 = dma.done.wait [#allocation3], 128  }
  0x2f   :  { %854 = vsyncadd [#allocation3], 4294967168 }
  0x30   :  { %855 = dma.done.wait [#allocation5], 4736  }
  0x31   :  { %856 = vsyncadd [#allocation5], 4294962560 }
  0x32   :  { %857 = dma.done.wait [#allocation8], 2048  }
  0x33   :  { %858 = vsyncadd [#allocation8], 4294965248  ;;  %v867_v0 = vmov 0   ;;  %v86_v1 = vld [vmem:[#allocation4 + $0x20] sm:$0x33]  ;;  %vm128_vm0 = vcmask 1041408   ;;  %v89_v55 = vlaneseq }
  0x34   :  { %167 = vmatprep.mubr.bf16.mxu0 %v867_v0  ;;  %v618_v2 = vcombine.high %v86_v1, %v86_v1  ;;  %v617_v3 = vcombine.low %v86_v1, %v86_v1  ;;  %v703_v4 = vld [vmem:[#allocation4 + $0x14] ss:$8 sps:$4 sm:$0xff]   ;;  %v705_v6 = vld [vmem:[#allocation4 + $0x10] ss:$8 sps:$4 sm:$0xff]   ;;  %v706_v9 = vld [vmem:[#allocation4 + $0x4] ss:$8 sps:$4 sm:$0xff]  }
  0x35   :  { %v709_v7 = vld [vmem:[#allocation6 + $0x74] ss:$8 sps:$4 sm:$0xff]   ;;  %v711_v8 = vld [vmem:[#allocation6 + $0x70] ss:$8 sps:$4 sm:$0xff]   ;;  %v712_v10 = vld [vmem:[#allocation6 + $0x64] ss:$8 sps:$4 sm:$0xff]  }
  0x36   :  { %619 = vmatprep.subr.msk.bf16.mxu0 %vm128_vm0, %v618_v2  ;;  %v130_v5 = vsel %vm128_vm0, %v617_v3, 0  ;;  %v708_v11 = vld [vmem:[#allocation4] ss:$8 sps:$4 sm:$0xff]   ;;  %384 = vmatprep.subr.bf16.mxu1 %v709_v7  ;;  %v80_v13 = vld [vmem:[#allocation2] sm:$0xff]  ;;  %vm124_vm1 = vcmask 293888   ;;  %v761_v47 = vld [vmem:[#allocation7 + $0x68] sm:$0xff]  }
  0x37   :  { %146 = vmatpush1.bf16.msra.mxu0 %v130_v5  ;;  %385 = vmatpush1.bf16.msra.mxu1 %v711_v8  ;;  %v714_v12 = vld [vmem:[#allocation6 + $0x60] ss:$8 sps:$4 sm:$0xff]   ;;  %v715_v14 = vld [vmem:[#allocation6 + $0x54] ss:$8 sps:$4 sm:$0xff]   ;;  %v81_v15 = vpack.c.bf16 %v80_v13, %v80_v13  ;;  %v717_v16 = vld [vmem:[#allocation6 + $0x50] ss:$8 sps:$4 sm:$0xff]  }
  0x38   :  { %147 = vmatprep.subr.bf16.mxu0 %v703_v4  ;;  %386 = vmatprep.subr.bf16.mxu1 %v712_v10  ;;  %v718_v17 = vld [vmem:[#allocation6 + $0x44] ss:$8 sps:$4 sm:$0xff]   ;;  %v720_v18 = vld [vmem:[#allocation6 + $0x40] ss:$8 sps:$4 sm:$0xff]   ;;  %v721_v19 = vld [vmem:[#allocation6 + $0x34] ss:$8 sps:$4 sm:$0xff]  }
  0x39   :  { %v723_v20 = vld [vmem:[#allocation6 + $0x30] ss:$8 sps:$4 sm:$0xff]   ;;  %v724_v21 = vld [vmem:[#allocation6 + $0x24] ss:$8 sps:$4 sm:$0xff]   ;;  %v726_v22 = vld [vmem:[#allocation6 + $0x20] ss:$8 sps:$4 sm:$0xff]  }
  0x3a   :  { %v727_v23 = vld [vmem:[#allocation6 + $0x14] ss:$8 sps:$4 sm:$0xff]   ;;  %v729_v24 = vld [vmem:[#allocation6 + $0x10] ss:$8 sps:$4 sm:$0xff]   ;;  %v730_v25 = vld [vmem:[#allocation6 + $0x4] ss:$8 sps:$4 sm:$0xff]  }
  0x3b   :  { %148 = vmatpush1.bf16.msra.mxu0 %v705_v6  ;;  %387 = vmatpush1.bf16.msra.mxu1 %v714_v12  ;;  %v732_v26 = vld [vmem:[#allocation6] ss:$8 sps:$4 sm:$0xff]   ;;  %v733_v27 = vld [vmem:[#allocation6 + $0xf4] ss:$8 sps:$4 sm:$0xff]   ;;  %v735_v28 = vld [vmem:[#allocation6 + $0xf0] ss:$8 sps:$4 sm:$0xff]  }
  0x3c   :  { %149 = vmatprep.subr.bf16.mxu0 %v706_v9  ;;  %388 = vmatprep.subr.bf16.mxu1 %v715_v14  ;;  %v736_v29 = vld [vmem:[#allocation6 + $0xe4] ss:$8 sps:$4 sm:$0xff]   ;;  %v738_v30 = vld [vmem:[#allocation6 + $0xe0] ss:$8 sps:$4 sm:$0xff]   ;;  %v739_v31 = vld [vmem:[#allocation6 + $0xd4] ss:$8 sps:$4 sm:$0xff]  }
  0x3d   :  { %v741_v32 = vld [vmem:[#allocation6 + $0xd0] ss:$8 sps:$4 sm:$0xff]   ;;  %v742_v33 = vld [vmem:[#allocation6 + $0xc4] ss:$8 sps:$4 sm:$0xff]   ;;  %v744_v34 = vld [vmem:[#allocation6 + $0xc0] ss:$8 sps:$4 sm:$0xff]  }
  0x3e   :  { %v745_v35 = vld [vmem:[#allocation6 + $0xb4] ss:$8 sps:$4 sm:$0xff]   ;;  %v747_v36 = vld [vmem:[#allocation6 + $0xb0] ss:$8 sps:$4 sm:$0xff]   ;;  %v748_v37 = vld [vmem:[#allocation6 + $0xa4] ss:$8 sps:$4 sm:$0xff]  }
  0x3f   :  { %150 = vmatpush1.bf16.msra.mxu0 %v708_v11  ;;  %389 = vmatpush1.bf16.msra.mxu1 %v717_v16  ;;  %v750_v38 = vld [vmem:[#allocation6 + $0xa0] ss:$8 sps:$4 sm:$0xff]   ;;  %v751_v39 = vld [vmem:[#allocation6 + $0x94] ss:$8 sps:$4 sm:$0xff]   ;;  %v753_v40 = vld [vmem:[#allocation6 + $0x90] ss:$8 sps:$4 sm:$0xff]  }
  0x40   :  { %390 = vmatprep.subr.bf16.mxu1 %v718_v17  ;;  %v754_v41 = vld [vmem:[#allocation6 + $0x84] ss:$8 sps:$4 sm:$0xff]   ;;  %v756_v42 = vld [vmem:[#allocation6 + $0x80] ss:$8 sps:$4 sm:$0xff]   ;;  %v757_v43 = vld [vmem:[#allocation7 + $0x78] sm:$0xff]   ;;  %v90_v56 = vshrl.u32 %v89_v55, 7 }
  0x41   :  { %v758_v44 = vld [vmem:[#allocation7 + $0x38] sm:$0xff]   ;;  %v759_v45 = vld [vmem:[#allocation7 + $0x70] sm:$0xff]   ;;  %670 = vmatprep.subr.bf16.mxu0 %v757_v43  ;;  %v762_v48 = vld [vmem:[#allocation7 + $0x28] sm:$0xff]  }
  0x42   :  { %620 = vmatmul.mubr.msk.bf16.vlgmr.msra.gmra.mxu0 %vm124_vm1, %v81_v15  ;;  %v760_v46 = vld [vmem:[#allocation7 + $0x30] sm:$0xff]   ;;  %v763_v49 = vld [vmem:[#allocation7 + $0x60] sm:$0xff]   ;;  %v765_v51 = vld [vmem:[#allocation7 + $0x58] sm:$0xff]   ;;  %v91_v57 = vsub.s32 0, %v90_v56  ;;  %v95_v59 = vsub.s32 1, %v90_v56 }
  0x43   :  { %391 = vmatpush1.bf16.msra.mxu1 %v720_v18  ;;  %671 = vmatpush3.bf16.msra.mxu0 %v758_v44  ;;  %v764_v50 = vld [vmem:[#allocation7 + $0x20] sm:$0xff]   ;;  %v766_v52 = vld [vmem:[#allocation7 + $0x18] sm:$0xff]   ;;  %v767_v53 = vld [vmem:[#allocation7 + $0x50] sm:$0xff]  }
  0x44   :  { %392 = vmatprep.subr.bf16.mxu1 %v721_v19  ;;  %672 = vmatprep.subr.bf16.mxu0 %v759_v45  ;;  %v768_v54 = vld [vmem:[#allocation7 + $0x10] sm:$0xff]   ;;  %v769_v8 = vld [vmem:[#allocation7 + $0x48] sm:$0xff]   ;;  %v771_v10 = vld [vmem:[#allocation7 + $0x40] sm:$0xff]  }
  0x45   :  { %v87_v58 = vld [vmem:[%s934_s2] sm:$0x3]  ;;  %v770_v9 = vld [vmem:[#allocation7 + $0x8] sm:$0xff]   ;;  %v772_v11 = vld [vmem:[#allocation7] sm:$0xff]  }
  0x46   :  { %v92_v60 = vrot.slane %v87_v58, %v91_v57  ;;  %v96_v61 = vrot.slane %v87_v58, %v95_v59  ;;  %v212_v12 = vld [vmem:[%s936_s4] sm:$0x3] }
  0x47   :  { %393 = vmatpush1.bf16.msra.mxu1 %v723_v20  ;;  %673 = vmatpush3.bf16.msra.mxu0 %v760_v46  ;;  %v217_v13 = vrot.slane %v212_v12, %v91_v57  ;;  %v221_v14 = vrot.slane %v212_v12, %v95_v59 }
  0x48   :  { %394 = vmatprep.subr.bf16.mxu1 %v724_v21  ;;  %674 = vmatprep.subr.bf16.mxu0 %v761_v47 }
  0x4b   :  { %395 = vmatpush1.bf16.msra.mxu1 %v726_v22  ;;  %675 = vmatpush3.bf16.msra.mxu0 %v762_v48 }
  0x4c   :  { %396 = vmatprep.subr.bf16.mxu1 %v727_v23  ;;  %676 = vmatprep.subr.bf16.mxu0 %v763_v49 }
  0x4f   :  { %397 = vmatpush1.bf16.msra.mxu1 %v729_v24  ;;  %677 = vmatpush3.bf16.msra.mxu0 %v764_v50 }
  0x50   :  { %398 = vmatprep.subr.bf16.mxu1 %v730_v25  ;;  %678 = vmatprep.subr.bf16.mxu0 %v765_v51 }
  0x53   :  { %399 = vmatpush1.bf16.msra.mxu1 %v732_v26  ;;  %679 = vmatpush3.bf16.msra.mxu0 %v766_v52  ;;  %v653_v26 = vld [vmem:[%s938_s6] ss:$0 sm:$0xff] }
  0x54   :  { %400 = vmatprep.subr.bf16.mxu1 %v733_v27  ;;  %680 = vmatprep.subr.bf16.mxu0 %v767_v53 }
  0x57   :  { %401 = vmatpush2.bf16.msra.mxu1 %v735_v28  ;;  %681 = vmatpush3.bf16.msra.mxu0 %v768_v54 }
  0x58   :  { %402 = vmatprep.subr.bf16.mxu1 %v736_v29  ;;  %682 = vmatprep.subr.bf16.mxu0 %v769_v8 }
  0x5b   :  { %403 = vmatpush2.bf16.msra.mxu1 %v738_v30  ;;  %683 = vmatpush3.bf16.msra.mxu0 %v770_v9 }
  0x5c   :  { %404 = vmatprep.subr.bf16.mxu1 %v739_v31  ;;  %684 = vmatprep.subr.bf16.mxu0 %v771_v10 }
  0x5f   :  { %405 = vmatpush2.bf16.msra.mxu1 %v741_v32  ;;  %685 = vmatpush3.bf16.msra.mxu0 %v772_v11 }
  0x60   :  { %406 = vmatprep.subr.bf16.mxu1 %v742_v33 }
  0x63   :  { %407 = vmatpush2.bf16.msra.mxu1 %v744_v34 }
  0x64   :  { %408 = vmatprep.subr.bf16.mxu1 %v745_v35 }
  0x67   :  { %409 = vmatpush2.bf16.msra.mxu1 %v747_v36 }
  0x68   :  { %410 = vmatprep.subr.bf16.mxu1 %v748_v37 }
  0x6b   :  { %411 = vmatpush2.bf16.msra.mxu1 %v750_v38 }
  0x6c   :  { %412 = vmatprep.subr.bf16.mxu1 %v751_v39 }
  0x6f   :  { %413 = vmatpush2.bf16.msra.mxu1 %v753_v40 }
  0x70   :  { %414 = vmatprep.subr.bf16.mxu1 %v754_v41 }
  0x73   :  { %415 = vmatpush2.bf16.msra.mxu1 %v756_v42 }
 0x102   :  { %v169_v62 = vpop.f32.mrf.mxu0 }
 0x103   :  { %v170_v63 = vadd.f32 %v169_v62, %v92_v60 }
 0x104   :  { %v171_v0 = vpop.f32.mrf.mxu0 }
 0x105   :  { %v172_v1 = vadd.f32 %v171_v0, %v96_v61  ;;  %v176_v2 = vmax.f32 %v170_v63, 0.0 }
 0x106   :  { %v173_v3 = vpop.f32.mrf.mxu0 }
 0x107   :  { %v177_v4 = vmax.f32 %v172_v1, 0.0  ;;  %v178_v7 = vpack.c.bf16 %v176_v2, %v176_v2 }
 0x108   :  { %v174_v5 = vpop.f32.mrf.mxu0 }
 0x109   :  { %v179_v6 = vpack.c.bf16 %v177_v4, %v177_v4 }
 0x10b   :  { %416 = vmatprep.mubr.bf16.mxu1 %v179_v6 }
 0x10c   :  { %417 = vmatmul.mubr.bf16.vlgmr.msra.gmra.mxu1 %v178_v7 }
 0x1cc   :  { %v418_v15 = vpop.f32.mrf.mxu1 }
 0x1cd   :  { %v419_v16 = vadd.f32 %v418_v15, %v217_v13 }
 0x1ce   :  { %v420_v17 = vpop.f32.mrf.mxu1 }
 0x1cf   :  { %v421_v18 = vadd.f32 %v420_v17, %v221_v14  ;;  %v425_v19 = vmax.f32 %v419_v16, 0.0 }
 0x1d0   :  { %v422_v20 = vpop.f32.mrf.mxu1 }
 0x1d1   :  { %v426_v21 = vmax.f32 %v421_v18, 0.0  ;;  %v427_v24 = vpack.c.bf16 %v425_v19, %v425_v19 }
 0x1d2   :  { %v423_v22 = vpop.f32.mrf.mxu1 }
 0x1d3   :  { %v428_v23 = vpack.c.bf16 %v426_v21, %v426_v21 }
 0x1d5   :  { %596 = vmatprep.mubr.bf16.mxu0 %v428_v23 }
 0x1d6   :  { %597 = vmatmul.mubr.bf16.vlgmr.msra.gmra.mxu0 %v427_v24 }
 0x296   :  { %v686_v25 = vpop.f32.mrf.mxu0 }
 0x298   :  { %v687_v27 = vpop.f32.mrf.mxu0 }
 0x299   :  { %v688_v28 = vadd.f32 %v687_v27, %v686_v25 }
 0x29a   :  { %v689_v29 = vpop.f32.mrf.mxu0 }
 0x29b   :  { %v599_v30 = vadd.f32 %v688_v28, %v653_v26 }
 0x29c   :  { %v690_v31 = vpop.f32.mrf.mxu0 }
 0x29d   :  { %v604_v32 = vpack.c.bf16 %v599_v30, %v599_v30 }
 0x29f   :  { %605 = vst [vmem:[%s939_s7] sm:$0xf] %v604_v32 }
 0x2a0   :  { %610 = vsyncpa [#allocation3], 1 }
 0x2a1   :  { %611 = vsyncpa [#allocation5], 1 }
 0x2a2   :  { %612 = vsyncpa [#allocation8], 1 }

</bundles_post_ra>
